<compile_context>
chip_gen: v5e
topology: v5e:2x2
jax: 0.10.0
libtpu: 0.0.40
codegen_flags: <defaults>
</compile_context>

<pallas_src>
import functools

import jax
import jax.numpy as jnp
from jax import lax
from jax.experimental import pallas as pl
from jax.experimental.pallas import tpu as pltpu


def _label_smoothing_kernel(n_rows, has_remainder,
                            preds_ref, target_ref, loss_out_ref, nll_out_ref):
    """Writes this tile's two partial sums (broadcast over a (1, 8, 128) block).

    loss_out block <- sum over valid rows of -sum_c log_softmax(x)_c
    nll_out  block <- sum over valid rows of -log_softmax(x)[target]
    """
    i = pl.program_id(0)

    x = preds_ref[...]                                    # (TM, C) native dtype
    t = target_ref[...]                                   # (TM, 1) int32
    tm, c = x.shape

    # One fused pass over the centered logits s = x - row_max (f32 accumulation).
    row_max = jnp.max(x, axis=-1, keepdims=True)                          # (TM, 1)
    s = x.astype(jnp.float32) - row_max.astype(jnp.float32)               # (TM, C) f32
    sum_exp = jnp.sum(jnp.exp(s), axis=-1, keepdims=True)                 # (TM, 1)
    sum_s = jnp.sum(s, axis=-1, keepdims=True)                            # (TM, 1)
    col_ids = lax.broadcasted_iota(jnp.int32, s.shape, 1)                 # (TM, C)
    s_t = jnp.sum(jnp.where(col_ids == t, s, 0.0), axis=-1, keepdims=True)

    log_sum_exp = jnp.log(sum_exp)                                        # (TM, 1)
    neg_sum_logp = c * log_sum_exp - sum_s                                # (TM, 1)
    nll_row = log_sum_exp - s_t                                           # (TM, 1)

    # Mask padded rows only when an edge tile can exist (static decision).
    # NOTE: padded rows may hold garbage (even NaN/Inf after exp); jnp.where
    # *selects*, so the garbage never reaches the sums — keep it a select.
    if has_remainder:
        row_ids = i * tm + lax.broadcasted_iota(jnp.int32, (tm, 1), 0)    # (TM, 1)
        valid = row_ids < n_rows
        neg_sum_logp = jnp.where(valid, neg_sum_logp, 0.0)
        nll_row = jnp.where(valid, nll_row, 0.0)

    loss_part = jnp.sum(neg_sum_logp)
    nll_part = jnp.sum(nll_row)

    # Full-vreg, unmasked stores (one (1, 8, 128) block per tile); wrapper reads [0, 0].
    loss_out_ref[...] = jnp.broadcast_to(loss_part, loss_out_ref.shape)
    nll_out_ref[...] = jnp.broadcast_to(nll_part, nll_out_ref.shape)


def label_smoothing_loss(preds, target, epsilon=0.1, block_rows=None):
    """preds: (N, C) float (any dtype), target: (N,) int. Returns scalar float32."""
    assert preds.ndim == 2
    n_rows, n_classes = preds.shape
    target_2d = target.astype(jnp.int32).reshape(n_rows, 1)

    itemsize = jnp.dtype(preds.dtype).itemsize
    # Sublane packing: 8 rows for f32, 16 for bf16, 32 for int8/fp8.
    pack = max(8, 32 // max(1, itemsize))

    if block_rows is None:
        # ~2 MiB per preds block: with double-buffering plus the f32 temps
        # (s, exp(s)) and the int32 iota this stays comfortably inside the
        # default scoped VMEM on v5e/v6e and the 64 MiB physical VMEM on v7x.
        budget_bytes = 2 * 1024 * 1024
        block_rows = budget_bytes // max(1, n_classes * itemsize)
        block_rows = max(pack, min(512, (block_rows // pack) * pack))
        padded_rows = ((n_rows + pack - 1) // pack) * pack
        block_rows = min(block_rows, max(pack, padded_rows))

    num_tiles = pl.cdiv(n_rows, block_rows)
    has_remainder = (n_rows % block_rows) != 0

    kernel = functools.partial(_label_smoothing_kernel, n_rows, has_remainder)

    loss_parts, nll_parts = pl.pallas_call(
        kernel,
        out_shape=(
            jax.ShapeDtypeStruct((num_tiles, 8, 128), jnp.float32),
            jax.ShapeDtypeStruct((num_tiles, 8, 128), jnp.float32),
        ),
        grid=(num_tiles,),
        in_specs=[
            pl.BlockSpec((block_rows, n_classes), lambda i: (i, 0)),
            pl.BlockSpec((block_rows, 1), lambda i: (i, 0)),
        ],
        # Each grid step owns its own output block -> no resident accumulator,
        # so the row-tile axis can be "parallel" (megacore / v7x 2-TC sharding).
        out_specs=(
            pl.BlockSpec((1, 8, 128), lambda i: (i, 0, 0)),
            pl.BlockSpec((1, 8, 128), lambda i: (i, 0, 0)),
        ),
        compiler_params=pltpu.CompilerParams(
            dimension_semantics=("parallel",),
            vmem_limit_bytes=48 * 1024 * 1024),
    )(preds, target_2d)

    loss_mean = jnp.sum(loss_parts[:, 0, 0]) / n_rows
    nll_mean = jnp.sum(nll_parts[:, 0, 0]) / n_rows
    return epsilon * (loss_mean / n_classes) + (1.0 - epsilon) * nll_mean


def _reference(preds, target, epsilon=0.1):
    logp = jax.nn.log_softmax(preds.astype(jnp.float32), axis=-1)
    n = preds.shape[-1]
    loss = jnp.mean(-jnp.sum(logp, axis=-1))
    nll = jnp.mean(-jnp.take_along_axis(logp, target[:, None], axis=-1)[:, 0])
    return epsilon * (loss / n) + (1.0 - epsilon) * nll


if __name__ == "__main__":
    key = jax.random.PRNGKey(0)
    k1, k2, k3, k4, k5, k6 = jax.random.split(key, 6)

    # Case 1: f32, batch not a multiple of the row tile -> exercises edge masking.
    N1, C1 = 10, 32
    preds1 = jax.random.normal(k1, (N1, C1), dtype=jnp.float32)
    target1 = jax.random.randint(k2, (N1,), 0, C1, dtype=jnp.int32)
    out1 = jax.block_until_ready(
        label_smoothing_loss(preds1, target1, epsilon=0.1, block_rows=8))
    ref1 = _reference(preds1, target1, epsilon=0.1)
    assert jnp.allclose(out1, ref1, atol=1e-5, rtol=1e-5), (out1, ref1)

    # Case 2: bf16 input read in native dtype (no wrapper cast, no f32 tile copy),
    # auto block sizing (pack=16 rows for bf16).
    N2, C2 = 8, 128
    preds2 = jax.random.normal(k3, (N2, C2), dtype=jnp.float32).astype(jnp.bfloat16)
    target2 = jax.random.randint(k4, (N2,), 0, C2, dtype=jnp.int32)
    out2 = jax.block_until_ready(label_smoothing_loss(preds2, target2, epsilon=0.1))
    ref2 = _reference(preds2, target2, epsilon=0.1)  # reference also casts bf16->f32
    assert jnp.allclose(out2, ref2, atol=1e-4, rtol=1e-4), (out2, ref2)

    # Case 3: multiple full tiles, no remainder -> unmasked fast path + per-tile
    # parallel partial outputs reduced in the wrapper.
    N3, C3 = 24, 64
    preds3 = jax.random.normal(k5, (N3, C3), dtype=jnp.float32)
    target3 = jax.random.randint(k6, (N3,), 0, C3, dtype=jnp.int32)
    out3 = jax.block_until_ready(
        label_smoothing_loss(preds3, target3, epsilon=0.1, block_rows=8))
    ref3 = _reference(preds3, target3, epsilon=0.1)
    assert jnp.allclose(out3, ref3, atol=1e-5, rtol=1e-5), (out3, ref3)

    print("KERNEL_OK")
</pallas_src>

<mosaic_0001>
module attributes {stable_mosaic.version = 11 : i64} {
  func.func @_label_smoothing_kernel(%arg0: i32, %arg1: memref<8x32xf32, #tpu.memory_space<vmem>>, %arg2: memref<8x1xi32, #tpu.memory_space<vmem>>, %arg3: memref<1x8x128xf32, #tpu.memory_space<vmem>>, %arg4: memref<1x8x128xf32, #tpu.memory_space<vmem>>) attributes {dimension_semantics = [#tpu.dimension_semantics<parallel>], iteration_bounds = array<i64: 2>, scalar_prefetch = 0 : i64, scratch_operands = 0 : i64, tpu.core_type = #tpu.core_type<tc>, window_params = [{transform_indices = @transform_0, window_bounds = array<i64: 8, 32>}, {transform_indices = @transform_1, window_bounds = array<i64: 8, 1>}, {transform_indices = @transform_2, window_bounds = array<i64: 1, 8, 128>}, {transform_indices = @transform_3, window_bounds = array<i64: 1, 8, 128>}]} {
    %c0 = arith.constant 0 : index
    %c0_0 = arith.constant 0 : index
    %0 = vector.load %arg1[%c0, %c0_0] : memref<8x32xf32, #tpu.memory_space<vmem>>, vector<8x32xf32>
    %c0_1 = arith.constant 0 : index
    %c0_2 = arith.constant 0 : index
    %1 = vector.load %arg2[%c0_1, %c0_2] : memref<8x1xi32, #tpu.memory_space<vmem>>, vector<8x1xi32>
    %cst = arith.constant dense<0xFF800000> : vector<8xf32>
    %2 = vector.multi_reduction <maximumf>, %0, %cst [1] : vector<8x32xf32> to vector<8xf32>
    %3 = vector.shape_cast %2 : vector<8xf32> to vector<8x1xf32>
    %4 = vector.broadcast %3 : vector<8x1xf32> to vector<8x32xf32>
    %5 = arith.subf %0, %4 : vector<8x32xf32>
    %6 = math.exp %5 : vector<8x32xf32>
    %cst_3 = arith.constant dense<0.000000e+00> : vector<8xf32>
    %7 = vector.multi_reduction <add>, %6, %cst_3 [1] : vector<8x32xf32> to vector<8xf32>
    %8 = vector.shape_cast %7 : vector<8xf32> to vector<8x1xf32>
    %cst_4 = arith.constant dense<0.000000e+00> : vector<8xf32>
    %9 = vector.multi_reduction <add>, %5, %cst_4 [1] : vector<8x32xf32> to vector<8xf32>
    %10 = vector.shape_cast %9 : vector<8xf32> to vector<8x1xf32>
    %11 = tpu.iota {dimensions = array<i32: 1>} : vector<8x32xi32>
    %12 = vector.broadcast %1 : vector<8x1xi32> to vector<8x32xi32>
    %13 = arith.cmpi eq, %11, %12 : vector<8x32xi32>
    %cst_5 = arith.constant 0.000000e+00 : f32
    %14 = vector.broadcast %cst_5 : f32 to vector<8x32xf32>
    %15 = arith.select %13, %5, %14 : vector<8x32xi1>, vector<8x32xf32>
    %cst_6 = arith.constant dense<0.000000e+00> : vector<8xf32>
    %16 = vector.multi_reduction <add>, %15, %cst_6 [1] : vector<8x32xf32> to vector<8xf32>
    %17 = vector.shape_cast %16 : vector<8xf32> to vector<8x1xf32>
    %18 = math.log %8 : vector<8x1xf32>
    %cst_7 = arith.constant 3.200000e+01 : f32
    %19 = vector.broadcast %cst_7 : f32 to vector<8x1xf32>
    %20 = arith.mulf %19, %18 : vector<8x1xf32>
    %21 = arith.subf %20, %10 : vector<8x1xf32>
    %22 = arith.subf %18, %17 : vector<8x1xf32>
    %c8_i32 = arith.constant 8 : i32
    %23 = arith.muli %arg0, %c8_i32 : i32
    %24 = tpu.iota {dimensions = array<i32: 0>} : vector<8x1xi32>
    %25 = vector.broadcast %23 : i32 to vector<8x1xi32>
    %26 = arith.addi %25, %24 : vector<8x1xi32>
    %c10_i32 = arith.constant 10 : i32
    %27 = vector.broadcast %c10_i32 : i32 to vector<8x1xi32>
    %28 = arith.cmpi slt, %26, %27 : vector<8x1xi32>
    %cst_8 = arith.constant 0.000000e+00 : f32
    %29 = vector.broadcast %cst_8 : f32 to vector<8x1xf32>
    %30 = arith.select %28, %21, %29 : vector<8x1xi1>, vector<8x1xf32>
    %cst_9 = arith.constant 0.000000e+00 : f32
    %31 = vector.broadcast %cst_9 : f32 to vector<8x1xf32>
    %32 = arith.select %28, %22, %31 : vector<8x1xi1>, vector<8x1xf32>
    %33 = vector.shape_cast %30 : vector<8x1xf32> to vector<1x8x1xf32>
    %cst_10 = arith.constant dense<0.000000e+00> : vector<1xf32>
    %34 = vector.multi_reduction <add>, %33, %cst_10 [1, 2] : vector<1x8x1xf32> to vector<1xf32>
    %35 = vector.shape_cast %34 : vector<1xf32> to vector<1x1x1xf32>
    %36 = vector.extract %35[0, 0, 0] : f32 from vector<1x1x1xf32>
    %37 = vector.shape_cast %32 : vector<8x1xf32> to vector<1x8x1xf32>
    %cst_11 = arith.constant dense<0.000000e+00> : vector<1xf32>
    %38 = vector.multi_reduction <add>, %37, %cst_11 [1, 2] : vector<1x8x1xf32> to vector<1xf32>
    %39 = vector.shape_cast %38 : vector<1xf32> to vector<1x1x1xf32>
    %40 = vector.extract %39[0, 0, 0] : f32 from vector<1x1x1xf32>
    %41 = vector.broadcast %36 : f32 to vector<1x8x128xf32>
    %c0_12 = arith.constant 0 : index
    %c0_13 = arith.constant 0 : index
    %c0_14 = arith.constant 0 : index
    %42 = vector.load %arg3[%c0_12, %c0_13, %c0_14] : memref<1x8x128xf32, #tpu.memory_space<vmem>>, vector<1x8x128xf32>
    tpu.vector_store %arg3[%c0_12, %c0_13, %c0_14], %41 {strides = array<i32>} : memref<1x8x128xf32, #tpu.memory_space<vmem>>, vector<1x8x128xf32>,
    %43 = vector.broadcast %40 : f32 to vector<1x8x128xf32>
    %c0_15 = arith.constant 0 : index
    %c0_16 = arith.constant 0 : index
    %c0_17 = arith.constant 0 : index
    %44 = vector.load %arg4[%c0_15, %c0_16, %c0_17] : memref<1x8x128xf32, #tpu.memory_space<vmem>>, vector<1x8x128xf32>
    tpu.vector_store %arg4[%c0_15, %c0_16, %c0_17], %43 {strides = array<i32>} : memref<1x8x128xf32, #tpu.memory_space<vmem>>, vector<1x8x128xf32>,
    return
  }
  func.func @transform_0(%arg0: i32) -> (i32, i32) {
    %c0_i32 = arith.constant 0 : i32
    %c0_i32_0 = arith.constant 0 : i32
    return %arg0, %c0_i32 : i32, i32
  }
  func.func @transform_1(%arg0: i32) -> (i32, i32) {
    %c0_i32 = arith.constant 0 : i32
    %c0_i32_0 = arith.constant 0 : i32
    return %arg0, %c0_i32 : i32, i32
  }
  func.func @transform_2(%arg0: i32) -> (i32, i32, i32) {
    %c0_i32 = arith.constant 0 : i32
    %c0_i32_0 = arith.constant 0 : i32
    %c0_i32_1 = arith.constant 0 : i32
    return %arg0, %c0_i32, %c0_i32_0 : i32, i32, i32
  }
  func.func @transform_3(%arg0: i32) -> (i32, i32, i32) {
    %c0_i32 = arith.constant 0 : i32
    %c0_i32_0 = arith.constant 0 : i32
    %c0_i32_1 = arith.constant 0 : i32
    return %arg0, %c0_i32, %c0_i32_0 : i32, i32, i32
  }
}

</mosaic_0001>

<bundles_post_ra>
// kernel: tpu_custom_call.1
= control target key start
LH: loop header
LB: loop body
LE: loop exit
PB: predicated region body
PF: predicated region fallthrough
CT: control target
= control target key end

     0   :  { %9 = vsyncpa [#allocation3], 0  ;;  %s707_s0 = inlined_call_operand.vmem [shape: f32[10,32], index: 0, kind: input, shape index: {}]   ;;  %s708_s1 = inlined_call_operand.vmem [shape: s32[10,1], index: 1, kind: input, shape index: {}]   ;;  %s709_s2 = inlined_call_operand.hbm [shape: f32[2,8,128], index: 2, kind: output, shape index: {0}]   ;;  %s710_s3 = inlined_call_operand.hbm [shape: f32[2,8,128], index: 3, kind: output, shape index: {1}]  }
   0x1   :  { %11 = vsyncpa [#allocation3 + $0x1], 0 }
   0x2   :  { %12 = vsyncpa [#allocation5], 0 }
   0x3   :  { %14 = vsyncpa [#allocation5 + $0x1], 0  ;;  %s582_s12 = smov 0   ;;  %s584_s13 = smov 0  }
   0x4   :  { %s586_s14 = smov 0   ;;  %s588_s15 = smov 0  }
   0x5 LB: > { %s603_s16 = sadd.s32 4294967295, %s559_s15   ;;  %s396_s17 = sadd.s32 4294967294, %s559_s15   ;;  %s559_s15 = sphi %s588_s15, %s716_s15   ;;  %s555_s14 = sphi %s586_s14, %s715_s14   ;;  %s551_s13 = sphi %s584_s13, %s714_s13   ;;  %s547_s12 = sphi %s582_s12, %s713_s12  }
   0x6   : > { %s607_s18 = sadd.s32 1, %s559_s15   ;;  %s79_s19 = sadd.s32 1, %s555_s14 }
   0x7   : > { %s76_s20 = ssub.s32 %s559_s15, %s607_s18  ;;  %p89_p0 = scmp.ne.s32.totalorder %s555_s14, %s551_s13 }
   0x8   : > { %p77_p1 = scmp.eq.s32.totalorder %s76_s20, 0  ;;  %p90_p2 = scmp.eq.s32.totalorder %s603_s16, 1 }
   0x9   : > { %p95_p3 = scmp.ne.s32.totalorder %s551_s13, %s547_s12  ;;  %p96_p4 = scmp.eq.s32.totalorder %s396_s17, 1 }
   0xa   : > { %s618_s21 = scalar_select %p77_p1, %s555_s14, %s79_s19  }
   0xb   : > { %p620_p5 = por %p90_p2, %p89_p0  ;;  %p624_p6 = por %p96_p4, %p95_p3 }
   0xc   : > { %p399_p7 = scmp.ge.s32.totalorder %s559_s15, 1  ;;  %p154_p8 = scmp.lt.s32.totalorder %s559_s15, 3 }
   0xe   : > { %p155_p9 = pnand %p399_p7, %p154_p8 }
   0xf   : > { %p186_p10 = scmp.lt.s32.totalorder (!%p155_p9), %s603_s16, 1  ;;  %s643_s5 = sshll.u32 (!%p155_p9), %s603_s16, 3 }
  0x10   : > { %158 = sbr.rel (%p155_p9) target bundleno = 481 (0x1e1), region = 28  ;;  %s647_s6 = sand.u32 (!%p155_p9), 1, %s551_s13  }
  0x11   : > { %s400_s7 = sshll.u32 (!%p155_p9), %s647_s6, 3  ;;  %s273_s10 = scalar_lea.hbm (!%p155_p9), %s709_s2, %s643_s5 }
  0x12   : > { %s185_s11 = scalar_lea.vmem (!%p155_p9), [#allocation4], %s400_s7  ;;  %s287_s20 = scalar_lea.hbm (!%p155_p9), %s710_s3, %s643_s5 }
  0x13   : > { %s277_s26 = sshll.u32 (!%p155_p9), %s273_s10, 4  ;;  %s660_s27 = sshll.u32 (!%p155_p9), %s287_s20, 4  ;;  %s278_s26 = int_to_ptr.hbm [resolvable:$true] %s277_s26  ;;  %s292_s27 = int_to_ptr.hbm [resolvable:$true] %s660_s27 }
  0x14   : > { %s258_s30 = scalar_lea.sflag (!%p155_p9), [#allocation3], %s647_s6  ;;  %s485_s9 = scalar_lea.hbm (!%p155_p9), %s709_s2, 16 }
  0x15   : > { %v561_v0 = vmov 0   ;;  %s187_s24 = scalar_select %p186_p10, %s603_s16, 1  ;;  %vm196_vm0 = vcmask 261120   ;;  %v209_v9 = vlaneseq  ;;  %v227_v17 = vstv %s643_s5 }
  0x16   : > { %460 = vset.pattern.permute.xlu0 %v561_v0  ;;  %vm232_vm3 = vcmask 7168   ;;  %s289_s16 = sshll.u32 %s185_s11, 4  ;;  %s658_s16 = int_to_ptr.vmem [resolvable:$true] %s289_s16 }
  0x17   : > { %s402_s25 = sshll.u32 %s187_s24, 3  ;;  %v210_v10 = vand.u32 127, %v209_v9  ;;  %v226_v16 = vshrl.u32 %v209_v9, 7  ;;  %s178_s24 = scalar_lea.vmem [#allocation2], %s400_s7 }
  0x18   : > { %s189_s28 = scalar_lea.vmem %s707_s0, %s402_s25  ;;  %s193_s4 = scalar_lea.vmem %s708_s1, %s402_s25 }
  0x19   : > { %v194_v1 = vld [vmem:[%s189_s28] sm:$0xff]  ;;  %v228_v18 = vadd.s32 %v227_v17, %v226_v16  ;;  %s275_s25 = sshll.u32 %s178_s24, 4  ;;  %s276_s25 = int_to_ptr.vmem [resolvable:$true] %s275_s25 }
  0x1a   : > { %v197_v2 = vsel %vm196_vm0, %v194_v1, -inf  ;;  %v195_v3 = vld [vmem:[%s193_s4] sm:$0xff]  ;;  %s479_s4 = sshra.s32 %s278_s26, 4  ;;  %s480_s4 = int_to_ptr.hbm [resolvable:$true] %s479_s4 }
  0x1b   : > { %198 = vmax.xlane.f32.xlu0 %v197_v2  ;;  %vm229_vm2 = vcmp.lt.s32.totalorder %v228_v18, 10  ;;  %s481_s5 = scalar_lea.hbm %s480_s4, 8  ;;  %p486_p0 = scmp.lt.s32.totalorder %s480_s4, %s709_s2 }
  0x1c   : > { %p482_p11 = scmp.ne.s32.totalorder %s480_s4, %s481_s5  ;;  %p487_p1 = scmp.lt.s32.totalorder %s485_s9, %s481_s5 }
  0x1e   : > { %p483_p12 = pnand %p482_p11, %p620_p5  ;;  %p488_p2 = por %p487_p1, %p486_p0 }
  0x20   : > { %p484_p13 = pneg %p483_p12 }
  0x22   : > { %p489_p3 = pnand %p488_p2, %p484_p13 }
  0x2f   : > { %212 = vperm.xlu0 %460, %v195_v3  }
  0x8e   : > { %v199_v4 = vpop.xlane.xlu0 %198 }
  0x8f   : > { %v200_v5 = vsub.f32 %v194_v1, %v199_v4 }
  0x91   : > { %v201_v6 = vmul.f32 1.442695, %v200_v5  ;;  %v206_v12 = vsel %vm196_vm0, %v200_v5, 0.0 }
  0x93   : > { %461 = vpow2.f32 %v201_v6 }
  0x99   : > { %v462_v7 = vpop.eup %461 }
  0x9a   : > { %v203_v8 = vsel %vm196_vm0, %v462_v7, 0.0 }
  0x9b   : > { %204 = vadd.xlane.f32.xlu1 %v203_v8 }
  0xa1   : > { %v213_v11 = vpop.permute.xlu0 %212 }
  0xa2   : > { %vm214_vm1 = vcmp.eq.s32.totalorder %v210_v10, %v213_v11 }
  0xa3   : > { %207 = vadd.xlane.f32.xlu1 %v206_v12  ;;  %v215_v13 = vsel %vm214_vm1, %v200_v5, 0.0 }
  0xa4   : > { %v216_v14 = vsel %vm196_vm0, %v215_v13, 0.0 }
  0xa5   : > { %217 = vadd.xlane.f32.xlu2 %v216_v14 }
 0x10e   : > { %v205_v15 = vpop.xlane.xlu1 %204 }
 0x10f   : > { %463 = vlog2.f32 %v205_v15 }
 0x115   : > { %v464_v19 = vpop.eup %463 }
 0x116   : > { %v220_v20 = vmul.f32 0.6931472, %v464_v19  ;;  %v208_v23 = vpop.xlane.xlu1 %207 }
 0x118   : > { %v221_v21 = vmul.f32 32.0, %v220_v20  ;;  %v218_v22 = vpop.xlane.xlu2 %217 }
 0x119   : > { %v223_v24 = vsub.f32 %v220_v20, %v218_v22 }
 0x11a   : > { %v222_v25 = vsub.f32 %v221_v21, %v208_v23 }
 0x11b   : > { %v231_v26 = vsel %vm229_vm2, %v223_v24, 0.0 }
 0x11c   : > { %v243_v27 = vsel %vm232_vm3, %v231_v26, 0.0  ;;  %v230_v28 = vsel %vm229_vm2, %v222_v25, 0.0 }
 0x11d   : > { %244 = vadd.xlane.f32.xlu1 %v243_v27  ;;  %v233_v29 = vsel %vm232_vm3, %v230_v28, 0.0 }
 0x11e   : > { %234 = vadd.xlane.f32.xlu2 %v233_v29 }
 0x190   : > { %v245_v30 = vpop.xlane.xlu1 %244 }
 0x191   : > { %v246_v31 = vrot.slane %v245_v30, 4  ;;  %v235_v32 = vpop.xlane.xlu2 %234 }
 0x192   : > { %v236_v33 = vrot.slane %v235_v32, 4 }
 0x193   : > { %v247_v34 = vadd.f32 %v246_v31, %v245_v30 }
 0x194   : > { %v237_v35 = vadd.f32 %v236_v33, %v235_v32 }
 0x195   : > { %v248_v36 = vrot.slane %v247_v34, 2 }
 0x196   : > { %v238_v37 = vrot.slane %v237_v35, 2 }
 0x197   : > { %v249_v38 = vadd.f32 %v248_v36, %v247_v34 }
 0x198   : > { %v239_v39 = vadd.f32 %v238_v37, %v237_v35 }
 0x199   : > { %v250_v40 = vrot.slane %v249_v38, 1 }
 0x19a   : > { %v240_v41 = vrot.slane %v239_v39, 1 }
 0x19b   : > { %v251_v42 = vadd.f32 %v250_v40, %v249_v38 }
 0x19c   : > { %v241_v43 = vadd.f32 %v240_v41, %v239_v39 }
 0x19e   : > { %411 = vpush %v241_v43 }
 0x19f   : > { %413 = vpush %v251_v42 }
 0x1cf   : > { %s412_s28 = spop %411 }
 0x1d0   : > { %v253_v44 = vstv %s412_s28  ;;  %s414_s29 = spop %413 }
 0x1d1   : > { %254 = vst [vmem:[%s178_s24] sm:$0xff] %v253_v44  ;;  %v255_v45 = vstv %s414_s29 }
 0x1d2   : > { %256 = vst [vmem:[%s185_s11] sm:$0xff] %v255_v45 }
 0x1d3   : > { %492 = shalt.err (!%p489_p3)
}
 0x1d4   : > { %415 = dma.vmem_to_hbm [thread:$0]  (%p620_p5), %s276_s25, 128, %s278_s26, %s258_s30  }
 0x1d5   : > { %s263_s11 = scalar_lea.sflag [#allocation5], %s647_s6  ;;  %s507_s19 = sshra.s32 %s292_s27, 4  ;;  %s508_s19 = int_to_ptr.hbm [resolvable:$true] %s507_s19 }
 0x1d6   : > { %s509_s20 = scalar_lea.hbm %s508_s19, 8  ;;  %s513_s29 = scalar_lea.hbm %s710_s3, 16 }
 0x1d7   : > { %p510_p4 = scmp.ne.s32.totalorder %s508_s19, %s509_s20  ;;  %p514_p9 = scmp.lt.s32.totalorder %s508_s19, %s710_s3 }
 0x1d8   : > { %p515_p10 = scmp.lt.s32.totalorder %s513_s29, %s509_s20 }
 0x1d9   : > { %p511_p7 = pnand %p510_p4, %p620_p5 }
 0x1da   : > { %p516_p11 = por %p515_p10, %p514_p9 }
 0x1db   : > { %p512_p8 = pneg %p511_p7 }
 0x1dd   : > { %p517_p12 = pnand %p516_p11, %p512_p8 }
 0x1df   : > { %520 = shalt.err (!%p517_p12)
}
 0x1e0   : > { %416 = dma.vmem_to_hbm [thread:$0]  (%p620_p5), %s658_s16, 128, %s292_s27, %s263_s11  }
 0x1e1 PF: > { %p426_p13 = scmp.ge.s32.totalorder %s559_s15, 2  ;;  %s303_s6 = sand.u32 1, %s547_s12  }
 0x1e2   : > { %s304_s25 = scalar_lea.sflag [#allocation3], %s303_s6 }
 0x1e3   : > { %p420_p0 = pnand %p426_p13, %p624_p6 }
 0x1e5   : > { %p421_p1 = pneg %p420_p0 }
 0x1e7   : > { %538 = dma.done.wait (%p421_p1), %s304_s25, 128  }
 0x1e8   : > { %540 = vsyncadd (%p421_p1), %s304_s25, 4294967168  ;;  %s314_s26 = scalar_lea.sflag [#allocation5], %s303_s6 }
 0x1e9   : > { %542 = dma.done.wait (%p421_p1), %s314_s26, 128  }
 0x1ea   : > { %544 = vsyncadd (%p421_p1), %s314_s26, 4294967168  ;;  %p17_p5 = scmp.ge.s32.totalorder %s607_s18, 4   ;;  %s713_s12 = smov %s551_s13 }
 0x1eb   : > { %s714_s13 = smov %s555_s14  ;;  %s715_s14 = smov %s618_s21 }
 0x1ec   : > { %s716_s15 = smov %s607_s18  ;;  %19 = sbr.rel (!%p17_p5) target bundleno = 5 (0x5), region = 83 }
 0x1f1   :  { %320 = vsyncpa [#allocation3], 1 }
 0x1f2   :  { %322 = vsyncpa [#allocation3 + $0x1], 1 }
 0x1f3   :  { %323 = vsyncpa [#allocation5], 1 }
 0x1f4   :  { %325 = vsyncpa [#allocation5 + $0x1], 1 }

</bundles_post_ra>
